<compile_context>
chip_gen: v7x
topology: tpu7x:2x2x1
jax: 0.10.0
libtpu: 0.0.40
codegen_flags: <defaults>
</compile_context>

<pallas_src>
import functools

import jax
import jax.numpy as jnp
from jax import lax
from jax.experimental import pallas as pl
from jax.experimental.pallas import tpu as pltpu

NUM_HEADS = 4
LN_EPS = 1e-5
NEG_INF = -1e30      # finite mask sentinel; exp() of it underflows to exactly 0

TD_MAX = 256         # dst-node tile (moderate, so large graphs keep >=2 parallel tiles)
TS_MAX = 512         # src-node tile (reduction axis); big tiles amortize step overhead


def _round_up(n, m):
    return (n + m - 1) // m * m


def _vmem_limit_bytes():
    # v7x has only 64 MiB VMEM per TensorCore (vs 128 MiB on v5e/v6e): derive the
    # scoped limit from the chip instead of hardcoding a v6e-sized value.
    try:
        cap = pltpu.get_tpu_info().vmem_capacity_bytes
    except Exception:
        cap = 64 * 1024 * 1024
    return int(min(cap * 3 // 4, 96 * 1024 * 1024))


VMEM_LIMIT = _vmem_limit_bytes()


def _choose_tiles(n):
    n128 = _round_up(max(n, 1), 128)
    if n128 >= TS_MAX:
        td, ts = TD_MAX, TS_MAX
        n_pad = _round_up(n, TS_MAX)     # multiple of both TD and TS; even dst-tile count
    else:
        td = ts = n128                   # small graphs: single tile pair
        n_pad = n128
    return td, ts, n_pad


# ----------------------------------------------------------------------------
# Kernel 1: fused Q|K|V|skip projection -> lane-dense slabs
#   dst slab : [Q(scaled heads-concat) | skip]   (tile, H*C + C)  f32
#   kv slab  : [K^T ; V^T] head-major rows       (2*H*C, tile)    bf16
# ----------------------------------------------------------------------------
def qkvs_proj_kernel(x_ref, w_ref, b_ref, dst_ref, kvt_ref, *, heads, head_dim):
    hc = heads * head_dim
    x = x_ref[...].astype(jnp.bfloat16)
    w = w_ref[...].astype(jnp.bfloat16)
    # One wide matmul (bf16 MXU operands, f32 accumulate) instead of 12 tiny ones.
    proj = jnp.dot(x, w, preferred_element_type=jnp.float32) + b_ref[0, :]

    # dst-keyed slab: Q (1/sqrt(C) already folded into the weights) + skip.
    dst_ref[...] = jnp.concatenate(
        [proj[:, :hc], proj[:, 3 * hc:]], axis=-1).astype(dst_ref.dtype)

    # src-keyed slab: K and V transposed so the node axis is the (lane-dense) last
    # dim; rows are [K h0..h3 | V h0..h3], each `head_dim` rows.
    kvt_ref[...] = proj[:, hc:3 * hc].astype(jnp.bfloat16).T


def qkvs_projection(x_pad, w_cat, b_cat, *, heads, head_dim, tile):
    n_pad, f_in = x_pad.shape
    w_cols = w_cat.shape[1]
    hc = heads * head_dim
    out_shapes = (
        jax.ShapeDtypeStruct((n_pad, hc + head_dim), jnp.float32),   # [Q | skip]
        jax.ShapeDtypeStruct((2 * hc, n_pad), jnp.bfloat16),         # [K^T ; V^T]
    )
    return pl.pallas_call(
        functools.partial(qkvs_proj_kernel, heads=heads, head_dim=head_dim),
        out_shape=out_shapes,
        grid=(n_pad // tile,),
        in_specs=[
            pl.BlockSpec((tile, f_in), lambda i: (i, 0)),
            pl.BlockSpec((f_in, w_cols), lambda i: (0, 0)),
            pl.BlockSpec((1, w_cols), lambda i: (0, 0)),
        ],
        out_specs=(
            pl.BlockSpec((tile, hc + head_dim), lambda i: (i, 0)),
            pl.BlockSpec((2 * hc, tile), lambda i: (0, i)),
        ),
        compiler_params=pltpu.CompilerParams(
            dimension_semantics=("parallel",),
            vmem_limit_bytes=VMEM_LIMIT),
    )(x_pad, w_cat, b_cat)


# ----------------------------------------------------------------------------
# Kernel 2: tiled masked attention (online softmax, per-head loop) + skip
#           + fused LayerNorm (+ optional ReLU) (+ optional fused final Linear)
# ----------------------------------------------------------------------------
def attention_ln_kernel(tmask_ref, adj_ref, dst_ref, kvt_ref, g_ref, b_ref, *rest,
                        heads, head_dim, apply_relu, fuse_final):
    if fuse_final:
        wf_ref, bf_ref, o_ref, m_scr, l_scr, acc_scr = rest
    else:
        o_ref, m_scr, l_scr, acc_scr = rest

    i = pl.program_id(0)
    j = pl.program_id(1)
    ns = pl.num_programs(1)
    hc = heads * head_dim

    @pl.when(j == 0)
    def _():
        # m starts at 0 (not -inf): masked scores are NEG_INF so exp underflows to
        # exactly 0 -> the second adjacency select is not needed.
        m_scr[...] = jnp.zeros_like(m_scr)
        l_scr[...] = jnp.zeros_like(l_scr)
        acc_scr[...] = jnp.zeros_like(acc_scr)

    # Block-sparse skip: only do the score/exp/accumulate work for tile pairs that
    # contain at least one edge (flag computed once in the wrapper).
    @pl.when(tmask_ref[i * ns + j] > 0)
    def _():
        adj = adj_ref[...] > 0                               # (TD, TS) bool
        dst_all = dst_ref[...]                               # (TD, H*C + C) f32
        q_all = dst_all[:, :hc].astype(jnp.bfloat16)         # (TD, H*C)

        for h in range(heads):                               # one head live at a time
            q_h = q_all[:, h * head_dim:(h + 1) * head_dim]                 # (TD, C)
            k_t = kvt_ref[pl.ds(h * head_dim, head_dim), :]                 # (C, TS)
            v_t = kvt_ref[pl.ds(hc + h * head_dim, head_dim), :]            # (C, TS)

            s = jnp.dot(q_h, k_t, preferred_element_type=jnp.float32)       # (TD, TS)
            s = jnp.where(adj, s, NEG_INF)                                   # single select

            m_prev = m_scr[h]                                                # (TD, 1)
            m_new = jnp.maximum(m_prev, jnp.max(s, axis=-1, keepdims=True))
            corr = jnp.exp(m_prev - m_new)
            # bf16 exp (EUP bf16 on v6e/v7x); statistics stay f32.
            p = jnp.exp((s - m_new).astype(jnp.bfloat16))                    # (TD, TS)

            l_scr[h] = corr * l_scr[h] + jnp.sum(
                p.astype(jnp.float32), axis=-1, keepdims=True)
            # P @ V with V held transposed (trans_b matmul).
            pv = lax.dot_general(p, v_t, (((1,), (1,)), ((), ())),
                                 preferred_element_type=jnp.float32)        # (TD, C)
            acc_scr[h] = corr * acc_scr[h] + pv
            m_scr[h] = m_new

    @pl.when(j == ns - 1)
    def _():
        # Epilogue: normalize, mean over heads, skip, LayerNorm (+ReLU) (+final Linear).
        inv_l = pl.reciprocal(jnp.maximum(l_scr[...], 1e-20), approx=False)  # (H, TD, 1)
        acc = acc_scr[...] * inv_l                                           # (H, TD, C)
        agg = acc[0]
        for h in range(1, heads):
            agg = agg + acc[h]
        agg = agg * (1.0 / heads)

        y = agg + dst_ref[...][:, hc:]                     # root/skip connection (f32)
        mean = jnp.mean(y, axis=-1, keepdims=True)
        var = jnp.mean((y - mean) ** 2, axis=-1, keepdims=True)
        y = (y - mean) * lax.rsqrt(var + LN_EPS)
        y = y * g_ref[0, :] + b_ref[0, :]
        if apply_relu:
            y = jnp.maximum(y, 0.0)
        if fuse_final:
            y = jnp.dot(y.astype(jnp.bfloat16), wf_ref[...].astype(jnp.bfloat16),
                        preferred_element_type=jnp.float32) + bf_ref[0, :]
        o_ref[...] = y.astype(o_ref.dtype)


def attention_ln(tmask, adj, dst_slab, kvt, gamma, beta, *, heads, head_dim,
                 td, ts, apply_relu, final_w=None, final_b=None):
    n_pad = dst_slab.shape[0]
    hc = heads * head_dim
    nd, ns = n_pad // td, n_pad // ts
    fuse_final = final_w is not None
    out_dim = final_w.shape[1] if fuse_final else head_dim

    in_specs = [
        pl.BlockSpec((td, ts), lambda i, j, tm: (i, j)),               # adj (int8)
        pl.BlockSpec((td, hc + head_dim), lambda i, j, tm: (i, 0)),    # [Q | skip]
        pl.BlockSpec((2 * hc, ts), lambda i, j, tm: (0, j)),           # [K^T ; V^T]
        pl.BlockSpec((1, head_dim), lambda i, j, tm: (0, 0)),          # LN gamma
        pl.BlockSpec((1, head_dim), lambda i, j, tm: (0, 0)),          # LN beta
    ]
    operands = [tmask, adj, dst_slab, kvt, gamma, beta]
    if fuse_final:
        in_specs += [
            pl.BlockSpec((head_dim, out_dim), lambda i, j, tm: (0, 0)),  # final W
            pl.BlockSpec((1, out_dim), lambda i, j, tm: (0, 0)),         # final b
        ]
        operands += [final_w, final_b]

    grid_spec = pltpu.PrefetchScalarGridSpec(
        num_scalar_prefetch=1,
        grid=(nd, ns),
        in_specs=in_specs,
        out_specs=pl.BlockSpec((td, out_dim), lambda i, j, tm: (i, 0)),
        scratch_shapes=[
            pltpu.VMEM((heads, td, 1), jnp.float32),        # running max
            pltpu.VMEM((heads, td, 1), jnp.float32),        # running sum
            pltpu.VMEM((heads, td, head_dim), jnp.float32), # accumulator
        ])
    return pl.pallas_call(
        functools.partial(attention_ln_kernel, heads=heads, head_dim=head_dim,
                          apply_relu=apply_relu, fuse_final=fuse_final),
        out_shape=jax.ShapeDtypeStruct((n_pad, out_dim), jnp.float32),
        grid_spec=grid_spec,
        compiler_params=pltpu.CompilerParams(
            dimension_semantics=("parallel", "arbitrary"),
            vmem_limit_bytes=VMEM_LIMIT),
    )(*operands)


# ----------------------------------------------------------------------------
# Parameter init (deterministic, shapes mirror the PyTorch module)
# ----------------------------------------------------------------------------
def _init_linear(key, fin, fout):
    kw, kb = jax.random.split(key)
    w = jax.random.normal(kw, (fin, fout), jnp.float32) * (fin ** -0.5)
    b = jax.random.normal(kb, (1, fout), jnp.float32) * 0.01
    return w, b


def init_transformer_conv(key, in_ch, out_ch, heads):
    kq, kk, kv, ks = jax.random.split(key, 4)
    wq, bq = _init_linear(kq, in_ch, heads * out_ch)
    wk, bk = _init_linear(kk, in_ch, heads * out_ch)
    wv, bv = _init_linear(kv, in_ch, heads * out_ch)
    ws, bs = _init_linear(ks, in_ch, out_ch)        # concat=False -> skip to out_ch
    scale = float(out_ch) ** -0.5                   # fold 1/sqrt(C) into Q proj
    w_cat = jnp.concatenate([wq * scale, wk, wv, ws], axis=1)
    b_cat = jnp.concatenate([bq * scale, bk, bv, bs], axis=1)
    return dict(w_cat=w_cat, b_cat=b_cat, head_dim=out_ch)


def init_params(key, in_channels, hidden_channels, out_channels, num_layers):
    keys = jax.random.split(key, num_layers + 2)
    params = {
        "conv1": init_transformer_conv(keys[0], in_channels, hidden_channels, NUM_HEADS),
        "conv_list": [init_transformer_conv(keys[1 + k], hidden_channels,
                                            hidden_channels, NUM_HEADS)
                      for k in range(num_layers - 1)],
        "ln_gamma": jnp.ones((1, hidden_channels), jnp.float32),
        "ln_beta": jnp.zeros((1, hidden_channels), jnp.float32),
    }
    wf, bf = _init_linear(keys[-1], hidden_channels, out_channels)
    params["w_final"] = wf
    params["b_final"] = bf
    return params


# ----------------------------------------------------------------------------
# Full model forward
# ----------------------------------------------------------------------------
def transformer_model_forward(x, edge_index, params, num_layers=2):
    n = x.shape[0]
    td, ts, n_pad = _choose_tiles(n)
    x_pad = jnp.pad(x, ((0, n_pad - n), (0, 0)))

    # int8 dense adjacency mask: adj[dst, src] = 1 for each edge.
    # TODO(synk): for very large sparse graphs, replace the dense [N,N] mask with a
    # compacted nonzero-tile-pair grid (data-dependent index_map) and/or a 1-bit
    # packed adjacency to eliminate the N^2 adj HBM traffic entirely.
    src, dst = edge_index[0], edge_index[1]
    adj = jnp.zeros((n_pad, n_pad), jnp.int8).at[dst, src].set(1)

    # Per-(dst-tile, src-tile) "has any edge" flags, scalar-prefetched to SMEM so
    # the attention kernel skips all-empty tile pairs.
    nd, ns = n_pad // td, n_pad // ts
    tmask = jnp.any(adj.reshape(nd, td, ns, ts) > 0, axis=(1, 3))
    tmask = tmask.astype(jnp.int32).reshape(-1)

    layers = [params["conv1"]] + list(params["conv_list"])
    h = x_pad
    for idx, lp in enumerate(layers):
        is_last = idx == len(layers) - 1
        # Reference placement: ReLU after conv1 and after every non-final conv_list
        # layer; final layer is conv -> LN -> (fused) final Linear.
        apply_relu = (idx == 0) or (not is_last)
        dst_slab, kvt = qkvs_projection(
            h, lp["w_cat"], lp["b_cat"],
            heads=NUM_HEADS, head_dim=lp["head_dim"], tile=td)
        h = attention_ln(
            tmask, adj, dst_slab, kvt,
            params["ln_gamma"], params["ln_beta"],
            heads=NUM_HEADS, head_dim=lp["head_dim"], td=td, ts=ts,
            apply_relu=apply_relu,
            final_w=params["w_final"] if is_last else None,
            final_b=params["b_final"] if is_last else None)
    # TODO(synk): dropout is treated as identity (eval-mode semantics).
    return h[:n]


if __name__ == "__main__":
    key = jax.random.PRNGKey(0)
    k_x, k_p = jax.random.split(key)

    N = 8               # nodes
    IN_CH = 8
    HIDDEN = 16
    OUT_CH = 4
    NUM_LAYERS = 2

    x = jax.random.normal(k_x, (N, IN_CH), jnp.float32)
    src = jnp.array([0, 1, 2, 3, 4, 5, 6, 7, 0, 2, 4, 6, 1, 3, 5, 7], jnp.int32)
    dst = jnp.array([1, 2, 3, 4, 5, 6, 7, 0, 4, 6, 0, 2, 5, 7, 1, 3], jnp.int32)
    edge_index = jnp.stack([src, dst])  # (2, E)

    params = init_params(k_p, IN_CH, HIDDEN, OUT_CH, NUM_LAYERS)

    out = transformer_model_forward(x, edge_index, params, num_layers=NUM_LAYERS)
    out = jax.block_until_ready(out)
    assert out.shape == (N, OUT_CH)
    assert bool(jnp.all(jnp.isfinite(out)))
    print("KERNEL_OK")
</pallas_src>

<mosaic_0001>
module attributes {stable_mosaic.version = 11 : i64} {
  func.func @qkvs_proj_kernel(%arg0: i32, %arg1: memref<128x8xf32, #tpu.memory_space<vmem>>, %arg2: memref<8x208xf32, #tpu.memory_space<vmem>>, %arg3: memref<1x208xf32, #tpu.memory_space<vmem>>, %arg4: memref<128x80xf32, #tpu.memory_space<vmem>>, %arg5: memref<128x128xbf16, #tpu.memory_space<vmem>>) attributes {dimension_semantics = [#tpu.dimension_semantics<parallel>], iteration_bounds = array<i64: 1>, scalar_prefetch = 0 : i64, scratch_operands = 0 : i64, tpu.core_type = #tpu.core_type<tc>, window_params = [{transform_indices = @transform_0, window_bounds = array<i64: 128, 8>}, {pipeline_mode = #tpu.pipeline_mode<synchronous>, transform_indices = @transform_1, window_bounds = array<i64: 8, 208>}, {pipeline_mode = #tpu.pipeline_mode<synchronous>, transform_indices = @transform_2, window_bounds = array<i64: 1, 208>}, {transform_indices = @transform_3, window_bounds = array<i64: 128, 80>}, {transform_indices = @transform_4, window_bounds = array<i64: 128, 128>}]} {
    %c0 = arith.constant 0 : index
    %c0_0 = arith.constant 0 : index
    %0 = vector.load %arg1[%c0, %c0_0] : memref<128x8xf32, #tpu.memory_space<vmem>>, vector<128x8xf32>
    %1 = arith.truncf %0 : vector<128x8xf32> to vector<128x8xbf16>
    %c0_1 = arith.constant 0 : index
    %c0_2 = arith.constant 0 : index
    %2 = vector.load %arg2[%c0_1, %c0_2] : memref<8x208xf32, #tpu.memory_space<vmem>>, vector<8x208xf32>
    %3 = arith.truncf %2 : vector<8x208xf32> to vector<8x208xbf16>
    %cst = arith.constant dense<0.000000e+00> : vector<128x208xf32>
    %4 = tpu.matmul %1, %3, %cst {dimension_numbers = #tpu.dot_dimension_numbers<[1], [0], [0], [1], [0, 0, 1, 1], [], []>} : vector<128x8xbf16>, vector<8x208xbf16>, vector<128x208xf32> -> vector<128x208xf32>
    %c0_3 = arith.constant 0 : index
    %c0_4 = arith.constant 0 : index
    %5 = vector.load %arg3[%c0_3, %c0_4] : memref<1x208xf32, #tpu.memory_space<vmem>>, vector<1x208xf32>
    %6 = vector.shape_cast %5 : vector<1x208xf32> to vector<208xf32>
    %7 = vector.shape_cast %6 : vector<208xf32> to vector<1x208xf32>
    %8 = vector.broadcast %7 : vector<1x208xf32> to vector<128x208xf32>
    %9 = arith.addf %4, %8 : vector<128x208xf32>
    %10 = vector.extract_strided_slice %9 {offsets = [0, 0], sizes = [128, 64], strides = [1, 1]} : vector<128x208xf32> to vector<128x64xf32>
    %11 = vector.extract_strided_slice %9 {offsets = [0, 192], sizes = [128, 16], strides = [1, 1]} : vector<128x208xf32> to vector<128x16xf32>
    %12 = tpu.concatenate %10, %11 in 1 : vector<128x64xf32>, vector<128x16xf32> -> vector<128x80xf32>
    %c0_5 = arith.constant 0 : index
    %c0_6 = arith.constant 0 : index
    %13 = vector.load %arg4[%c0_5, %c0_6] : memref<128x80xf32, #tpu.memory_space<vmem>>, vector<128x80xf32>
    tpu.vector_store %arg4[%c0_5, %c0_6], %12 {strides = array<i32>} : memref<128x80xf32, #tpu.memory_space<vmem>>, vector<128x80xf32>,
    %14 = vector.extract_strided_slice %9 {offsets = [0, 64], sizes = [128, 128], strides = [1, 1]} : vector<128x208xf32> to vector<128x128xf32>
    %15 = arith.truncf %14 : vector<128x128xf32> to vector<128x128xbf16>
    %16 = tpu.transpose %15, [1, 0] : vector<128x128xbf16> -> vector<128x128xbf16>
    %c0_7 = arith.constant 0 : index
    %c0_8 = arith.constant 0 : index
    %17 = vector.load %arg5[%c0_7, %c0_8] : memref<128x128xbf16, #tpu.memory_space<vmem>>, vector<128x128xbf16>
    tpu.vector_store %arg5[%c0_7, %c0_8], %16 {strides = array<i32>} : memref<128x128xbf16, #tpu.memory_space<vmem>>, vector<128x128xbf16>,
    return
  }
  func.func @transform_0(%arg0: i32) -> (i32, i32) {
    %c0_i32 = arith.constant 0 : i32
    %c0_i32_0 = arith.constant 0 : i32
    return %arg0, %c0_i32 : i32, i32
  }
  func.func @transform_1(%arg0: i32) -> (i32, i32) {
    %c0_i32 = arith.constant 0 : i32
    %c0_i32_0 = arith.constant 0 : i32
    %c0_i32_1 = arith.constant 0 : i32
    return %c0_i32, %c0_i32_0 : i32, i32
  }
  func.func @transform_2(%arg0: i32) -> (i32, i32) {
    %c0_i32 = arith.constant 0 : i32
    %c0_i32_0 = arith.constant 0 : i32
    %c0_i32_1 = arith.constant 0 : i32
    return %c0_i32, %c0_i32_0 : i32, i32
  }
  func.func @transform_3(%arg0: i32) -> (i32, i32) {
    %c0_i32 = arith.constant 0 : i32
    %c0_i32_0 = arith.constant 0 : i32
    return %arg0, %c0_i32 : i32, i32
  }
  func.func @transform_4(%arg0: i32) -> (i32, i32) {
    %c0_i32 = arith.constant 0 : i32
    %c0_i32_0 = arith.constant 0 : i32
    return %c0_i32, %arg0 : i32, i32
  }
}

</mosaic_0001>

<bundles_post_ra>
// kernel: tpu_custom_call.1
= control target key start
LH: loop header
LB: loop body
LE: loop exit
PB: predicated region body
PF: predicated region fallthrough
CT: control target
= control target key end

     0   :  { %vm83_vm0 = vcmask 1043456   ;;  %v481_v5 = vmov 0   ;;  %vm58_vm1 = vcmask 64512   ;;  %s729_s0 = inlined_call_operand.vmem [shape: f32[128,8], index: 0, kind: input, shape index: {}]   ;;  %s730_s1 = inlined_call_operand.vmem [shape: f32[8,208], index: 1, kind: input, shape index: {}]   ;;  %s731_s2 = inlined_call_operand.vmem [shape: f32[1,208], index: 2, kind: input, shape index: {}]   ;;  %s732_s3 = inlined_call_operand.vmem [shape: f32[128,80], index: 3, kind: output, shape index: {0}]   ;;  %s733_s4 = inlined_call_operand.hbm [shape: bf16[128,128], index: 4, kind: output, shape index: {1}]  }
   0x1   :  { %v43_v0 = vld [vmem:[%s730_s1 + $0x8] sm:$0xff]  ;;  %v42_v1 = vld [vmem:[%s730_s1] sm:$0xff]  ;;  %122 = vmatprep.mubr.bf16.mxu0 %v481_v5  ;;  %162 = vmatprep.mubr.bf16.mxu1 %v481_v5 }
   0x2   :  { %v18_v2 = vld [vmem:[%s729_s0] sm:$0xff]  ;;  %v45_v3 = vpack.c.bf16 %v43_v0, %v43_v0  ;;  %v44_v4 = vpack.c.bf16 %v42_v1, %v42_v1  ;;  %v19_v6 = vld [vmem:[%s729_s0 + $0x8] sm:$0xff] }
   0x3   :  { %v26_v7 = vld [vmem:[%s729_s0 + $0x40] sm:$0xff]  ;;  %v27_v8 = vld [vmem:[%s729_s0 + $0x48] sm:$0xff]  ;;  %v34_v10 = vpack.c.bf16 %v19_v6, %v18_v2 }
   0x4   :  { %426 = vmatprep.subr.msk.bf16.mxu0 %vm83_vm0, %v45_v3  ;;  %451 = vmatprep.subr.msk.bf16.mxu1 %vm83_vm0, %v45_v3  ;;  %v85_v9 = vsel %vm83_vm0, %v44_v4, 0  ;;  %v38_v11 = vpack.c.bf16 %v27_v8, %v26_v7 }
   0x5   :  { %91 = vmatpush1.bf16.msra.mxu0 %v85_v9  ;;  %452 = vmatpush1.bf16.msra.mxu1 %v85_v9 }
   0x6   :  { %10 = vsyncpa [#allocation3], 0  ;;  %v20_v12 = vld [vmem:[%s729_s0 + $0x10] sm:$0xff]  ;;  %v21_v13 = vld [vmem:[%s729_s0 + $0x18] sm:$0xff]  ;;  %v48_v30 = vlaneseq  ;;  %vm203_vm2 = vcmask 523264   ;;  %vm220_vm3 = vcmask 654336  }
   0x7   :  { %v28_v14 = vld [vmem:[%s729_s0 + $0x50] sm:$0xff]  ;;  %v29_v15 = vld [vmem:[%s729_s0 + $0x58] sm:$0xff]  ;;  %v35_v16 = vpack.c.bf16 %v21_v13, %v20_v12  ;;  %v22_v18 = vld [vmem:[%s729_s0 + $0x20] sm:$0xff]  ;;  %s482_s5 = smov 64  }
   0x8   :  { %427 = vmatmul.mubr.msk.bf16.vlgmr.msra.gmra.mrb[0].mxu0 %vm58_vm1, %v34_v10  ;;  %431 = vmatmul.mubr.msk.bf16.vlgmr.msra.gmra.mrb[0].mxu1 %vm58_vm1, %v38_v11  ;;  %v39_v17 = vpack.c.bf16 %v29_v15, %v28_v14  ;;  %v23_v19 = vld [vmem:[%s729_s0 + $0x28] sm:$0xff]  ;;  %v30_v20 = vld [vmem:[%s729_s0 + $0x60] sm:$0xff]  ;;  %v24_v24 = vld [vmem:[%s729_s0 + $0x30] sm:$0xff]  ;;  %v49_v31 = vshrl.u32 %v48_v30, 7 }
   0x9   :  { %132 = vmatprep.mubr.bf16.mxu0 %v481_v5  ;;  %172 = vmatprep.mubr.bf16.mxu1 %v481_v5  ;;  %v31_v21 = vld [vmem:[%s729_s0 + $0x68] sm:$0xff]  ;;  %v36_v22 = vpack.c.bf16 %v23_v19, %v22_v18  ;;  %v25_v25 = vld [vmem:[%s729_s0 + $0x38] sm:$0xff]  ;;  %v32_v26 = vld [vmem:[%s729_s0 + $0x70] sm:$0xff] }
   0xa   :  { %v40_v23 = vpack.c.bf16 %v31_v21, %v30_v20  ;;  %v33_v27 = vld [vmem:[%s729_s0 + $0x78] sm:$0xff]  ;;  %v37_v28 = vpack.c.bf16 %v25_v25, %v24_v24  ;;  %v50_v32 = vsub.s32 0, %v49_v31  ;;  %v46_v33 = vld [vmem:[%s731_s2] sm:$0x3]  ;;  %v54_v34 = vsub.s32 1, %v49_v31 }
   0xb   :  { %v41_v29 = vpack.c.bf16 %v33_v27, %v32_v26 }
   0xc   :  { %v575_v35 = vrot.slane %v46_v33, %v50_v32  ;;  %v577_v36 = vrot.slane %v46_v33, %v54_v34 }
  0x10   :  { %428 = vmatmul.mubr.msk.bf16.gmra.mrb[4].mxu0 %vm58_vm1, %v35_v16  ;;  %432 = vmatmul.mubr.msk.bf16.gmra.mrb[4].mxu1 %vm58_vm1, %v39_v17 }
  0x11   :  { %142 = vmatprep.mubr.bf16.mxu0 %v481_v5  ;;  %182 = vmatprep.mubr.bf16.mxu1 %v481_v5 }
  0x18   :  { %429 = vmatmul.mubr.msk.bf16.gmra.mrb[8].mxu0 %vm58_vm1, %v36_v22  ;;  %433 = vmatmul.mubr.msk.bf16.gmra.mrb[8].mxu1 %vm58_vm1, %v40_v23 }
  0x19   :  { %152 = vmatprep.mubr.bf16.mxu0 %v481_v5  ;;  %192 = vmatprep.mubr.bf16.mxu1 %v481_v5 }
  0x20   :  { %430 = vmatmul.mubr.msk.bf16.gmra.mrb[12].mxu0 %vm58_vm1, %v37_v28  ;;  %434 = vmatmul.mubr.msk.bf16.gmra.mrb[12].mxu1 %vm58_vm1, %v41_v29 }
  0xdb   :  { %v124_v37 = vpop.f32.mrb[0].mxu0  ;;  %v164_v38 = vpop.f32.mrb[0].mxu1 }
  0xdc   :  { %v125_v39 = vadd.f32 %v124_v37, %v575_v35  ;;  %v126_v40 = vpop.f32.mrb[1].mxu0  ;;  %v165_v41 = vadd.f32 %v164_v38, %v575_v35  ;;  %v166_v42 = vpop.f32.mrb[1].mxu1 }
  0xdd   :  { %v127_v43 = vadd.f32 %v126_v40, %v577_v36  ;;  %v128_v44 = vpop.f32.mrb[2].mxu0  ;;  %v167_v45 = vadd.f32 %v166_v42, %v577_v36  ;;  %v168_v46 = vpop.f32.mrb[2].mxu1 }
  0xde   :  { %v129_v47 = vadd.f32 %v128_v44, %v575_v35  ;;  %v130_v48 = vpop.f32.mrb[3].mxu0  ;;  %v169_v49 = vadd.f32 %v168_v46, %v575_v35  ;;  %v170_v50 = vpop.f32.mrb[3].mxu1 }
  0xdf   :  { %v204_v51 = vsel %vm203_vm2, %v125_v39, %v127_v43  ;;  %v212_v52 = vsel %vm203_vm2, %v165_v41, %v167_v45  ;;  %v131_v53 = vadd.f32 %v130_v48, %v577_v36  ;;  %v171_v54 = vadd.f32 %v170_v50, %v577_v36 }
  0xe0   :  { %221 = vst.msk [vmem:[%s732_s3] sm:$0xff] %vm220_vm3, %v204_v51  ;;  %229 = vst.msk [vmem:[%s732_s3 + $0x40] sm:$0xff] %vm220_vm3, %v212_v52  ;;  %v245_v55 = vpack.c.bf16 %v169_v49, %v165_v41  ;;  %v237_v56 = vpack.c.bf16 %v129_v47, %v125_v39 }
  0xe1   :  { %v205_v57 = vsel %vm203_vm2, %v129_v47, %v131_v53  ;;  %v238_v58 = vpack.c.bf16 %v131_v53, %v127_v43  ;;  %v213_v59 = vsel %vm203_vm2, %v169_v49, %v171_v54  ;;  %v246_v60 = vpack.c.bf16 %v171_v54, %v167_v45 }
  0xe2   :  { %222 = vst.msk [vmem:[%s732_s3 + $0x8] sm:$0xff] %vm220_vm3, %v205_v57  ;;  %230 = vst.msk [vmem:[%s732_s3 + $0x48] sm:$0xff] %vm220_vm3, %v213_v59  ;;  %269 = vrot.lane.b32.xlu0 %v237_v56, %s482_s5 }
  0xe3   :  { %v134_v61 = vpop.f32.mrb[4].mxu0  ;;  %287 = vrot.lane.b32.xlu1 %v246_v60, %s482_s5  ;;  %v174_v62 = vpop.f32.mrb[4].mxu1 }
  0xe4   :  { %v135_v63 = vadd.f32 %v134_v61, %v575_v35  ;;  %v136_v0 = vpop.f32.mrb[5].mxu0  ;;  %v175_v1 = vadd.f32 %v174_v62, %v575_v35  ;;  %v176_v2 = vpop.f32.mrb[5].mxu1 }
  0xe5   :  { %v137_v3 = vadd.f32 %v136_v0, %v577_v36  ;;  %v138_v4 = vpop.f32.mrb[6].mxu0  ;;  %v177_v5 = vadd.f32 %v176_v2, %v577_v36  ;;  %v178_v6 = vpop.f32.mrb[6].mxu1 }
  0xe6   :  { %v139_v7 = vadd.f32 %v138_v4, %v575_v35  ;;  %v140_v8 = vpop.f32.mrb[7].mxu0  ;;  %285 = vrot.lane.b32.xlu0 %v245_v55, %s482_s5  ;;  %v179_v9 = vadd.f32 %v178_v6, %v575_v35  ;;  %v180_v10 = vpop.f32.mrb[7].mxu1 }
  0xe7   :  { %v206_v11 = vsel %vm203_vm2, %v135_v63, %v137_v3  ;;  %v141_v12 = vadd.f32 %v140_v8, %v577_v36  ;;  %v214_v13 = vsel %vm203_vm2, %v175_v1, %v177_v5  ;;  %v181_v14 = vadd.f32 %v180_v10, %v577_v36 }
  0xe8   :  { %223 = vst.msk [vmem:[%s732_s3 + $0x10] sm:$0xff] %vm220_vm3, %v206_v11  ;;  %v239_v15 = vpack.c.bf16 %v139_v7, %v135_v63  ;;  %231 = vst.msk [vmem:[%s732_s3 + $0x50] sm:$0xff] %vm220_vm3, %v214_v13  ;;  %v247_v16 = vpack.c.bf16 %v179_v9, %v175_v1 }
  0xe9   :  { %v207_v17 = vsel %vm203_vm2, %v139_v7, %v141_v12  ;;  %v240_v18 = vpack.c.bf16 %v141_v12, %v137_v3  ;;  %v215_v19 = vsel %vm203_vm2, %v179_v9, %v181_v14  ;;  %v248_v20 = vpack.c.bf16 %v181_v14, %v177_v5 }
  0xea   :  { %224 = vst.msk [vmem:[%s732_s3 + $0x18] sm:$0xff] %vm220_vm3, %v207_v17  ;;  %273 = vrot.lane.b32.xlu1 %v239_v15, %s482_s5  ;;  %271 = vrot.lane.b32.xlu0 %v238_v58, %s482_s5  ;;  %232 = vst.msk [vmem:[%s732_s3 + $0x58] sm:$0xff] %vm220_vm3, %v215_v19 }
  0xeb   :  { %v144_v21 = vpop.f32.mrb[8].mxu0  ;;  %v184_v22 = vpop.f32.mrb[8].mxu1 }
  0xec   :  { %v145_v23 = vadd.f32 %v144_v21, %v575_v35  ;;  %v146_v24 = vpop.f32.mrb[9].mxu0  ;;  %v185_v25 = vadd.f32 %v184_v22, %v575_v35  ;;  %v186_v26 = vpop.f32.mrb[9].mxu1 }
  0xed   :  { %v147_v27 = vadd.f32 %v146_v24, %v577_v36  ;;  %v148_v28 = vpop.f32.mrb[10].mxu0  ;;  %v187_v29 = vadd.f32 %v186_v26, %v577_v36  ;;  %v188_v30 = vpop.f32.mrb[10].mxu1 }
  0xee   :  { %v149_v31 = vadd.f32 %v148_v28, %v575_v35  ;;  %v150_v32 = vpop.f32.mrb[11].mxu0  ;;  %275 = vrot.lane.b32.xlu1 %v240_v18, %s482_s5  ;;  %289 = vrot.lane.b32.xlu0 %v247_v16, %s482_s5  ;;  %v189_v33 = vadd.f32 %v188_v30, %v575_v35  ;;  %v190_v34 = vpop.f32.mrb[11].mxu1 }
  0xef   :  { %v208_v37 = vsel %vm203_vm2, %v145_v23, %v147_v27  ;;  %v151_v38 = vadd.f32 %v150_v32, %v577_v36  ;;  %v216_v39 = vsel %vm203_vm2, %v185_v25, %v187_v29  ;;  %v191_v40 = vadd.f32 %v190_v34, %v577_v36 }
  0xf0   :  { %225 = vst.msk [vmem:[%s732_s3 + $0x20] sm:$0xff] %vm220_vm3, %v208_v37  ;;  %v241_v41 = vpack.c.bf16 %v149_v31, %v145_v23  ;;  %233 = vst.msk [vmem:[%s732_s3 + $0x60] sm:$0xff] %vm220_vm3, %v216_v39  ;;  %v249_v42 = vpack.c.bf16 %v189_v33, %v185_v25 }
  0xf1   :  { %v209_v43 = vsel %vm203_vm2, %v149_v31, %v151_v38  ;;  %v242_v44 = vpack.c.bf16 %v151_v38, %v147_v27  ;;  %v217_v45 = vsel %vm203_vm2, %v189_v33, %v191_v40  ;;  %v250_v46 = vpack.c.bf16 %v191_v40, %v187_v29 }
  0xf2   :  { %226 = vst.msk [vmem:[%s732_s3 + $0x28] sm:$0xff] %vm220_vm3, %v209_v43  ;;  %291 = vrot.lane.b32.xlu1 %v248_v20, %s482_s5  ;;  %277 = vrot.lane.b32.xlu0 %v241_v41, %s482_s5  ;;  %234 = vst.msk [vmem:[%s732_s3 + $0x68] sm:$0xff] %vm220_vm3, %v217_v45 }
  0xf3   :  { %v154_v47 = vpop.f32.mrb[12].mxu0  ;;  %v194_v48 = vpop.f32.mrb[12].mxu1 }
  0xf4   :  { %v155_v49 = vadd.f32 %v154_v47, %v575_v35  ;;  %v156_v50 = vpop.f32.mrb[13].mxu0  ;;  %v195_v51 = vadd.f32 %v194_v48, %v575_v35  ;;  %v196_v52 = vpop.f32.mrb[13].mxu1 }
  0xf5   :  { %v157_v53 = vadd.f32 %v156_v50, %v577_v36  ;;  %v158_v54 = vpop.f32.mrb[14].mxu0  ;;  %v197_v55 = vadd.f32 %v196_v52, %v577_v36  ;;  %v198_v56 = vpop.f32.mrb[14].mxu1 }
  0xf6   :  { %v159_v57 = vadd.f32 %v158_v54, %v575_v35  ;;  %v160_v58 = vpop.f32.mrb[15].mxu0  ;;  %279 = vrot.lane.b32.xlu1 %v242_v44, %s482_s5  ;;  %v199_v59 = vadd.f32 %v198_v56, %v575_v35  ;;  %v200_v60 = vpop.f32.mrb[15].mxu1 }
  0xf7   :  { %v210_v61 = vsel %vm203_vm2, %v155_v49, %v157_v53  ;;  %v161_v62 = vadd.f32 %v160_v58, %v577_v36  ;;  %v218_v63 = vsel %vm203_vm2, %v195_v51, %v197_v55  ;;  %v201_v0 = vadd.f32 %v200_v60, %v577_v36 }
  0xf8   :  { %227 = vst.msk [vmem:[%s732_s3 + $0x30] sm:$0xff] %vm220_vm3, %v210_v61  ;;  %v243_v1 = vpack.c.bf16 %v159_v57, %v155_v49  ;;  %235 = vst.msk [vmem:[%s732_s3 + $0x70] sm:$0xff] %vm220_vm3, %v218_v63  ;;  %v251_v35 = vpack.c.bf16 %v199_v59, %v195_v51 }
  0xf9   :  { %v211_v2 = vsel %vm203_vm2, %v159_v57, %v161_v62  ;;  %v244_v3 = vpack.c.bf16 %v161_v62, %v157_v53  ;;  %v219_v4 = vsel %vm203_vm2, %v199_v59, %v201_v0  ;;  %v252_v5 = vpack.c.bf16 %v201_v0, %v197_v55 }
  0xfa   :  { %228 = vst.msk [vmem:[%s732_s3 + $0x38] sm:$0xff] %vm220_vm3, %v211_v2  ;;  %281 = vrot.lane.b32.xlu0 %v243_v1, %s482_s5  ;;  %236 = vst.msk [vmem:[%s732_s3 + $0x78] sm:$0xff] %vm220_vm3, %v219_v4  ;;  %s483_s3 = smov [#allocation2]  }
  0xfb   :  { %283 = vrot.lane.b32.xlu1 %v244_v3, %s482_s5  ;;  %s413_s27 = sshll.u32 %s483_s3, 4  ;;  %s414_s27 = int_to_ptr.vmem [resolvable:$true] %s413_s27 }
  0xfc   :  { %s457_s28 = scalar_lea.vmem %s414_s27, 1024  ;;  %p462_p1 = scmp.lt.s32.totalorder %s414_s27, %s414_s27 }
  0xfd   :  { %p458_p0 = scmp.ne.s32.totalorder %s414_s27, %s457_s28  ;;  %p463_p2 = scmp.lt.s32.totalorder %s457_s28, %s457_s28 }
  0xfe   :  { %293 = vrot.lane.b32.xlu0 %v249_v42, %s482_s5 }
  0xff   :  { %295 = vrot.lane.b32.xlu1 %v250_v46, %s482_s5  ;;  %p464_p3 = por %p463_p2, %p462_p1 }
 0x101   :  { %p465_p4 = pnand %p464_p3, %p458_p0 }
 0x102   :  { %297 = vrot.lane.b32.xlu0 %v251_v35, %s482_s5 }
 0x103   :  { %299 = vrot.lane.b32.xlu1 %v252_v5, %s482_s5 }
 0x154   :  { %v270_v36 = vpop.permute.xlu0 %269 }
 0x155   :  { %v288_v6 = vpop.permute.xlu1 %287 }
 0x158   :  { %v286_v7 = vpop.permute.xlu0 %285 }
 0x159   :  { %v306_v21 = vsel %vm203_vm2, %v286_v7, %v288_v6 }
 0x15c   :  { %v274_v8 = vpop.permute.xlu1 %273  ;;  %v272_v9 = vpop.permute.xlu0 %271 }
 0x15d   :  { %v302_v10 = vsel %vm203_vm2, %v270_v36, %v272_v9 }
 0x15e   :  { %318 = vxpose.xlu0.c.b16.start [1/8] %v302_v10, 128 }
 0x160   :  { %v276_v11 = vpop.permute.xlu1 %275  ;;  %v290_v13 = vpop.permute.xlu0 %289 }
 0x161   :  { %v303_v12 = vsel %vm203_vm2, %v274_v8, %v276_v11 }
 0x162   :  { %319 = vxpose.xlu0.c.b16.cont [2/8] %v303_v12, 128 }
 0x164   :  { %v292_v14 = vpop.permute.xlu1 %291  ;;  %v278_v15 = vpop.permute.xlu0 %277 }
 0x165   :  { %v307_v22 = vsel %vm203_vm2, %v290_v13, %v292_v14 }
 0x168   :  { %v280_v16 = vpop.permute.xlu1 %279 }
 0x169   :  { %v304_v17 = vsel %vm203_vm2, %v278_v15, %v280_v16 }
 0x16a   :  { %320 = vxpose.xlu0.c.b16.cont [3/8] %v304_v17, 128 }
 0x16c   :  { %v282_v18 = vpop.permute.xlu0 %281 }
 0x16d   :  { %v284_v19 = vpop.permute.xlu1 %283 }
 0x16e   :  { %v305_v20 = vsel %vm203_vm2, %v282_v18, %v284_v19 }
 0x16f   :  { %321 = vxpose.xlu0.c.b16.cont [4/8] %v305_v20, 128 }
 0x170   :  { %v294_v24 = vpop.permute.xlu0 %293 }
 0x171   :  { %v296_v23 = vpop.permute.xlu1 %295 }
 0x172   :  { %v308_v25 = vsel %vm203_vm2, %v294_v24, %v296_v23 }
 0x173   :  { %322 = vxpose.xlu0.c.b16.cont [5/8] %v306_v21, 128 }
 0x174   :  { %v298_v27 = vpop.permute.xlu0 %297 }
 0x175   :  { %v300_v26 = vpop.permute.xlu1 %299 }
 0x176   :  { %v309_v28 = vsel %vm203_vm2, %v298_v27, %v300_v26 }
 0x177   :  { %323 = vxpose.xlu0.c.b16.cont [6/8] %v307_v22, 128 }
 0x17b   :  { %324 = vxpose.xlu0.c.b16.cont [7/8] %v308_v25, 128 }
 0x17f   :  { %325 = vxpose.xlu0.c.b16.end [8/8] %v309_v28, 128 }
 0x1c9   :  { %v326_v29 = vpop.trf.xlu0 }
 0x1ca   :  { %v435_v30 = vcombine.low %v326_v29, %v326_v29  ;;  %v436_v31 = vcombine.high %v326_v29, %v326_v29 }
 0x1cc   :  { %390 = vst [vmem:[#allocation2] sm:$0xf] %v435_v30  ;;  %391 = vst [vmem:[#allocation2 + $0x4] sm:$0xf] %v436_v31 }
 0x1cd   :  { %v327_v32 = vpop.trf.xlu0 }
 0x1ce   :  { %v437_v33 = vcombine.low %v327_v32, %v327_v32  ;;  %v438_v34 = vcombine.high %v327_v32, %v327_v32 }
 0x1d0   :  { %392 = vst [vmem:[#allocation2 + $0x8] sm:$0xf] %v437_v33  ;;  %393 = vst [vmem:[#allocation2 + $0xc] sm:$0xf] %v438_v34 }
 0x1d1   :  { %v328_v37 = vpop.trf.xlu0 }
 0x1d2   :  { %v439_v38 = vcombine.low %v328_v37, %v328_v37  ;;  %v440_v39 = vcombine.high %v328_v37, %v328_v37 }
 0x1d4   :  { %394 = vst [vmem:[#allocation2 + $0x10] sm:$0xf] %v439_v38  ;;  %395 = vst [vmem:[#allocation2 + $0x14] sm:$0xf] %v440_v39 }
 0x1d5   :  { %v329_v40 = vpop.trf.xlu0 }
 0x1d6   :  { %v441_v41 = vcombine.low %v329_v40, %v329_v40  ;;  %v442_v42 = vcombine.high %v329_v40, %v329_v40 }
 0x1d8   :  { %396 = vst [vmem:[#allocation2 + $0x18] sm:$0xf] %v441_v41  ;;  %397 = vst [vmem:[#allocation2 + $0x1c] sm:$0xf] %v442_v42 }
 0x1d9   :  { %v330_v43 = vpop.trf.xlu0 }
 0x1da   :  { %v443_v44 = vcombine.low %v330_v43, %v330_v43  ;;  %v444_v45 = vcombine.high %v330_v43, %v330_v43 }
 0x1dc   :  { %398 = vst [vmem:[#allocation2 + $0x20] sm:$0xf] %v443_v44  ;;  %399 = vst [vmem:[#allocation2 + $0x24] sm:$0xf] %v444_v45 }
 0x1dd   :  { %v331_v46 = vpop.trf.xlu0 }
 0x1de   :  { %v445_v47 = vcombine.low %v331_v46, %v331_v46  ;;  %v446_v48 = vcombine.high %v331_v46, %v331_v46 }
 0x1e0   :  { %400 = vst [vmem:[#allocation2 + $0x28] sm:$0xf] %v445_v47  ;;  %401 = vst [vmem:[#allocation2 + $0x2c] sm:$0xf] %v446_v48 }
 0x1e1   :  { %v332_v49 = vpop.trf.xlu0 }
 0x1e2   :  { %v447_v50 = vcombine.low %v332_v49, %v332_v49  ;;  %v448_v51 = vcombine.high %v332_v49, %v332_v49 }
 0x1e4   :  { %402 = vst [vmem:[#allocation2 + $0x30] sm:$0xf] %v447_v50  ;;  %403 = vst [vmem:[#allocation2 + $0x34] sm:$0xf] %v448_v51 }
 0x1e5   :  { %v333_v52 = vpop.trf.xlu0 }
 0x1e6   :  { %v449_v53 = vcombine.low %v333_v52, %v333_v52  ;;  %v450_v54 = vcombine.high %v333_v52, %v333_v52 }
 0x1e8   :  { %404 = vst [vmem:[#allocation2 + $0x38] sm:$0xf] %v449_v53  ;;  %405 = vst [vmem:[#allocation2 + $0x3c] sm:$0xf] %v450_v54 }
 0x1e9   :  { %468 = shalt.err (!%p465_p4)
}
 0x1ea   :  { %s469_s6 = scalar_lea.hbm %s733_s4, 1024 }
 0x1eb   :  { %p470_p5 = scmp.ne.s32.totalorder %s733_s4, %s469_s6  ;;  %p473_p6 = scmp.lt.u32.totalorder %s469_s6, %s733_s4 }
 0x1ed   :  { %p475_p7 = pnand %p473_p6, %p470_p5 }
 0x1ef   :  { %478 = shalt.err (!%p475_p7)
}
 0x1f0   :  { %s484_s11 = smov 4  }
 0x1f1   :  { %419 = dma.vmem_to_hbm [thread:$0]  %s414_s27, 1024, %s733_s4, [#allocation3], %s482_s5, %s482_s5, %s484_s11  }
 0x1f2   :  { %479 = dma.done.wait [#allocation3], 1024  }
 0x1f3   :  { %480 = vsyncadd [#allocation3], 4294966272 }
 0x1f4   :  { %425 = vsyncpa [#allocation3], 1 }

</bundles_post_ra>
